<compile_context>
chip_gen: v7x
topology: tpu7x:2x2x1
jax: 0.10.0
libtpu: 0.0.40
codegen_flags: <defaults>
</compile_context>

<pallas_src>
import jax
import jax.numpy as jnp
from jax.experimental import pallas as pl
from jax.experimental.pallas import tpu as pltpu

D_IN, D_H, D_OUT = 802, 512, 32
D_OUT_PAD = 128   # lane-dense padded output width


def ray_kernel(x_ref, w12_ref, b12_ref, w3_ref, b3_ref, out_ref):
    # fused fc1+fc2 (no activation between) -> tanh1 -> fc3 -> tanh2 -> tanh3
    h = jnp.dot(x_ref[...], w12_ref[...],
                preferred_element_type=jnp.float32) + b12_ref[...]
    a = jnp.tanh(h)
    h3 = jnp.dot(a.astype(jnp.bfloat16), w3_ref[...],
                 preferred_element_type=jnp.float32) + b3_ref[...]
    out_ref[...] = jnp.tanh(jnp.tanh(h3))


def pack_params(p):
    """Fuse fc1/fc2, cast matmul operands to bf16, pad fc3 to 128 lanes."""
    w12 = (p["w1"] @ p["w2"]).astype(jnp.bfloat16)                 # (802, 512)
    b12 = (p["b1"] @ p["w2"] + p["b2"]).astype(jnp.float32)        # (1, 512)
    w3p = jnp.zeros((D_H, D_OUT_PAD), jnp.float32).at[:, :D_OUT].set(p["w3"])
    b3p = jnp.zeros((1, D_OUT_PAD), jnp.float32).at[:, :D_OUT].set(p["b3"])
    return {"w12": w12, "b12": b12,
            "w3": w3p.astype(jnp.bfloat16), "b3": b3p}


def ray_forward(x, packed, *, tb=None):
    """x: (B, 802). packed: output of pack_params. Returns (B, 32) float32."""
    B = x.shape[0]
    if tb is None:
        if B >= 512:
            tb = min(B // 2, 512)   # keep >= 2 parallel steps (v7x: 2 TCs)
        else:
            tb = B                  # one fused step for small batches
    assert B % tb == 0, f"batch {B} must be a multiple of tile {tb}"
    nt = B // tb

    grid_spec = pltpu.PrefetchScalarGridSpec(
        num_scalar_prefetch=0,
        grid=(nt,),
        in_specs=[
            pl.BlockSpec((tb, D_IN), lambda i: (i, 0)),         # x batch tile
            pl.BlockSpec((D_IN, D_H), lambda i: (0, 0)),        # fused W1@W2
            pl.BlockSpec((1, D_H), lambda i: (0, 0)),           # fused bias
            pl.BlockSpec((D_H, D_OUT_PAD), lambda i: (0, 0)),   # padded W3
            pl.BlockSpec((1, D_OUT_PAD), lambda i: (0, 0)),     # padded b3
        ],
        out_specs=pl.BlockSpec((tb, D_OUT_PAD), lambda i: (i, 0)),
    )

    out_pad = pl.pallas_call(
        ray_kernel,
        out_shape=jax.ShapeDtypeStruct((B, D_OUT_PAD), jnp.float32),
        grid_spec=grid_spec,
        compiler_params=pltpu.CompilerParams(
            dimension_semantics=("parallel",)),   # batch tiles independent
    )(x.astype(jnp.bfloat16), packed["w12"], packed["b12"],
      packed["w3"], packed["b3"])
    return out_pad[:, :D_OUT]


def ray_reference(x, p):
    # Pure f32, unfused reference matching the PyTorch module.
    h = x @ p["w1"] + p["b1"]
    h = h @ p["w2"] + p["b2"]
    h = jnp.tanh(h)
    h = h @ p["w3"] + p["b3"]
    return jnp.tanh(jnp.tanh(h))


def init_params(key):
    ks = jax.random.split(key, 6)
    s = 0.05
    # (in_dim, out_dim) layout == transpose of PyTorch nn.Linear weight.
    return {
        "w1": s * jax.random.normal(ks[0], (D_IN, D_H), jnp.float32),
        "b1": s * jax.random.normal(ks[1], (1, D_H), jnp.float32),
        "w2": s * jax.random.normal(ks[2], (D_H, D_H), jnp.float32),
        "b2": s * jax.random.normal(ks[3], (1, D_H), jnp.float32),
        "w3": s * jax.random.normal(ks[4], (D_H, D_OUT), jnp.float32),
        "b3": s * jax.random.normal(ks[5], (1, D_OUT), jnp.float32),
    }


if __name__ == "__main__":
    key = jax.random.PRNGKey(0)
    k_x, k_p = jax.random.split(key)

    B = 8                                           # small example batch
    x = jax.random.normal(k_x, (B, D_IN), jnp.float32)
    params = init_params(k_p)
    packed = pack_params(params)

    out = jax.block_until_ready(ray_forward(x, packed))
    ref = jax.block_until_ready(ray_reference(x, params))

    assert out.shape == (B, D_OUT), out.shape
    # bf16 MXU operands + fc1/fc2 pre-fusion introduce rounding vs the f32
    # reference; tolerance loosened accordingly.
    max_err = float(jnp.max(jnp.abs(out - ref)))
    assert max_err < 5e-2, f"max abs err {max_err}"
    print("KERNEL_OK")
</pallas_src>

<mosaic_0001>
module attributes {stable_mosaic.version = 11 : i64} {
  func.func @ray_kernel(%arg0: i32, %arg1: memref<8x802xbf16, #tpu.memory_space<vmem>>, %arg2: memref<802x512xbf16, #tpu.memory_space<vmem>>, %arg3: memref<1x512xf32, #tpu.memory_space<vmem>>, %arg4: memref<512x128xbf16, #tpu.memory_space<vmem>>, %arg5: memref<1x128xf32, #tpu.memory_space<vmem>>, %arg6: memref<8x128xf32, #tpu.memory_space<vmem>>) attributes {dimension_semantics = [#tpu.dimension_semantics<parallel>], iteration_bounds = array<i64: 1>, scalar_prefetch = 0 : i64, scratch_operands = 0 : i64, tpu.core_type = #tpu.core_type<tc>, window_params = [{transform_indices = @transform_0, window_bounds = array<i64: 8, 802>}, {pipeline_mode = #tpu.pipeline_mode<synchronous>, transform_indices = @transform_1, window_bounds = array<i64: 802, 512>}, {pipeline_mode = #tpu.pipeline_mode<synchronous>, transform_indices = @transform_2, window_bounds = array<i64: 1, 512>}, {pipeline_mode = #tpu.pipeline_mode<synchronous>, transform_indices = @transform_3, window_bounds = array<i64: 512, 128>}, {pipeline_mode = #tpu.pipeline_mode<synchronous>, transform_indices = @transform_4, window_bounds = array<i64: 1, 128>}, {transform_indices = @transform_5, window_bounds = array<i64: 8, 128>}]} {
    %c0 = arith.constant 0 : index
    %c0_0 = arith.constant 0 : index
    %0 = vector.load %arg1[%c0, %c0_0] : memref<8x802xbf16, #tpu.memory_space<vmem>>, vector<8x802xbf16>
    %c0_1 = arith.constant 0 : index
    %c0_2 = arith.constant 0 : index
    %1 = vector.load %arg2[%c0_1, %c0_2] : memref<802x512xbf16, #tpu.memory_space<vmem>>, vector<802x512xbf16>
    %cst = arith.constant dense<0.000000e+00> : vector<8x512xf32>
    %2 = tpu.matmul %0, %1, %cst {dimension_numbers = #tpu.dot_dimension_numbers<[1], [0], [0], [1], [0, 0, 1, 1], [], []>} : vector<8x802xbf16>, vector<802x512xbf16>, vector<8x512xf32> -> vector<8x512xf32>
    %c0_3 = arith.constant 0 : index
    %c0_4 = arith.constant 0 : index
    %3 = vector.load %arg3[%c0_3, %c0_4] : memref<1x512xf32, #tpu.memory_space<vmem>>, vector<1x512xf32>
    %4 = vector.broadcast %3 : vector<1x512xf32> to vector<8x512xf32>
    %5 = arith.addf %2, %4 : vector<8x512xf32>
    %6 = math.tanh %5 : vector<8x512xf32>
    %7 = arith.truncf %6 : vector<8x512xf32> to vector<8x512xbf16>
    %c0_5 = arith.constant 0 : index
    %c0_6 = arith.constant 0 : index
    %8 = vector.load %arg4[%c0_5, %c0_6] : memref<512x128xbf16, #tpu.memory_space<vmem>>, vector<512x128xbf16>
    %cst_7 = arith.constant dense<0.000000e+00> : vector<8x128xf32>
    %9 = tpu.matmul %7, %8, %cst_7 {dimension_numbers = #tpu.dot_dimension_numbers<[1], [0], [0], [1], [0, 0, 1, 1], [], []>} : vector<8x512xbf16>, vector<512x128xbf16>, vector<8x128xf32> -> vector<8x128xf32>
    %c0_8 = arith.constant 0 : index
    %c0_9 = arith.constant 0 : index
    %10 = vector.load %arg5[%c0_8, %c0_9] : memref<1x128xf32, #tpu.memory_space<vmem>>, vector<1x128xf32>
    %11 = vector.broadcast %10 : vector<1x128xf32> to vector<8x128xf32>
    %12 = arith.addf %9, %11 : vector<8x128xf32>
    %13 = math.tanh %12 : vector<8x128xf32>
    %14 = math.tanh %13 : vector<8x128xf32>
    %c0_10 = arith.constant 0 : index
    %c0_11 = arith.constant 0 : index
    %15 = vector.load %arg6[%c0_10, %c0_11] : memref<8x128xf32, #tpu.memory_space<vmem>>, vector<8x128xf32>
    tpu.vector_store %arg6[%c0_10, %c0_11], %14 {strides = array<i32>} : memref<8x128xf32, #tpu.memory_space<vmem>>, vector<8x128xf32>,
    return
  }
  func.func @transform_0(%arg0: i32) -> (i32, i32) {
    %c0_i32 = arith.constant 0 : i32
    %c0_i32_0 = arith.constant 0 : i32
    return %arg0, %c0_i32 : i32, i32
  }
  func.func @transform_1(%arg0: i32) -> (i32, i32) {
    %c0_i32 = arith.constant 0 : i32
    %c0_i32_0 = arith.constant 0 : i32
    %c0_i32_1 = arith.constant 0 : i32
    return %c0_i32, %c0_i32_0 : i32, i32
  }
  func.func @transform_2(%arg0: i32) -> (i32, i32) {
    %c0_i32 = arith.constant 0 : i32
    %c0_i32_0 = arith.constant 0 : i32
    %c0_i32_1 = arith.constant 0 : i32
    return %c0_i32, %c0_i32_0 : i32, i32
  }
  func.func @transform_3(%arg0: i32) -> (i32, i32) {
    %c0_i32 = arith.constant 0 : i32
    %c0_i32_0 = arith.constant 0 : i32
    %c0_i32_1 = arith.constant 0 : i32
    return %c0_i32, %c0_i32_0 : i32, i32
  }
  func.func @transform_4(%arg0: i32) -> (i32, i32) {
    %c0_i32 = arith.constant 0 : i32
    %c0_i32_0 = arith.constant 0 : i32
    %c0_i32_1 = arith.constant 0 : i32
    return %c0_i32, %c0_i32_0 : i32, i32
  }
  func.func @transform_5(%arg0: i32) -> (i32, i32) {
    %c0_i32 = arith.constant 0 : i32
    %c0_i32_0 = arith.constant 0 : i32
    return %arg0, %c0_i32 : i32, i32
  }
}

</mosaic_0001>

<bundles_post_ra>
// kernel: tpu_custom_call.1
= control target key start
LH: loop header
LB: loop body
LE: loop exit
PB: predicated region body
PF: predicated region fallthrough
CT: control target
= control target key end

     0   :  { %10 = vsyncpa [#allocation3], 0  ;;  %s2921_s0 = inlined_call_operand.hbm [shape: bf16[8,802], index: 0, kind: input, shape index: {}]   ;;  %s2922_s1 = inlined_call_operand.hbm [shape: bf16[802,512], index: 1, kind: input, shape index: {}]   ;;  %s2923_s2 = inlined_call_operand.vmem [shape: f32[1,512], index: 2, kind: input, shape index: {}]   ;;  %s2924_s3 = inlined_call_operand.hbm [shape: bf16[512,128], index: 3, kind: input, shape index: {}]   ;;  %s2925_s4 = inlined_call_operand.vmem [shape: f32[1,128], index: 4, kind: input, shape index: {}]   ;;  %s2926_s5 = inlined_call_operand.hbm [shape: f32[8,128], index: 5, kind: output, shape index: {}]  }
   0x1   :  { %11 = vsyncpa [#allocation6], 0 }
   0x2   :  { %12 = vsyncpa [#allocation4], 0  ;;  %s2816_s18 = smov [#allocation5]   ;;  %s2722_s22 = scalar_lea.hbm %s2922_s1, 25856 }
   0x3   :  { %s28_s19 = sshll.u32 %s2816_s18, 4  ;;  %p2723_p0 = scmp.ne.s32.totalorder %s2922_s1, %s2722_s22  ;;  %s29_s19 = int_to_ptr.vmem [resolvable:$true] %s28_s19 }
   0x4   :  { %p2726_p1 = scmp.lt.u32.totalorder %s2722_s22, %s2922_s1 }
   0x6   :  { %p2728_p2 = pnand %p2726_p1, %p2723_p0 }
   0x8   :  { %2731 = shalt.err (!%p2728_p2)
}
   0x9   :  { %s2732_s27 = scalar_lea.vmem %s29_s19, 25856  ;;  %p2737_p4 = scmp.lt.s32.totalorder %s29_s19, %s29_s19 }
   0xa   :  { %p2733_p3 = scmp.ne.s32.totalorder %s29_s19, %s2732_s27  ;;  %p2738_p5 = scmp.lt.s32.totalorder %s2732_s27, %s2732_s27 }
   0xc   :  { %p2739_p6 = por %p2738_p5, %p2737_p4 }
   0xe   :  { %p2740_p7 = pnand %p2739_p6, %p2733_p3 }
  0x10   :  { %2743 = shalt.err (!%p2740_p7)
}
  0x11   :  { %s2817_s28 = smov 256   ;;  %s2818_s29 = smov 16  }
  0x12   :  { %34 = dma.hbm_to_vmem [thread:$0]  %s2922_s1, 25856, %s29_s19, [#allocation6], %s2817_s28, %s2817_s28, %s2818_s29  }
  0x13   :  { %s2819_s7 = smov [#allocation2]   ;;  %s2820_s9 = smov [#allocation7]  }
  0x14   :  { %s19_s8 = sshll.u32 %s2819_s7, 4  ;;  %s42_s10 = sshll.u32 %s2820_s9, 4  ;;  %s20_s8 = int_to_ptr.vmem [resolvable:$true] %s19_s8  ;;  %s43_s10 = int_to_ptr.vmem [resolvable:$true] %s42_s10 }
  0x15   :  { %s2744_s13 = scalar_lea.hbm %s2921_s0, 448 }
  0x16   :  { %p2745_p8 = scmp.ne.s32.totalorder %s2921_s0, %s2744_s13  ;;  %p2748_p9 = scmp.lt.u32.totalorder %s2744_s13, %s2921_s0 }
  0x18   :  { %p2750_p10 = pnand %p2748_p9, %p2745_p8 }
  0x1a   :  { %2753 = shalt.err (!%p2750_p10)
}
  0x1b   :  { %s2754_s1 = scalar_lea.vmem %s20_s8, 448  ;;  %p2759_p12 = scmp.lt.s32.totalorder %s20_s8, %s20_s8 }
  0x1c   :  { %p2755_p11 = scmp.ne.s32.totalorder %s20_s8, %s2754_s1  ;;  %p2760_p13 = scmp.lt.s32.totalorder %s2754_s1, %s2754_s1 }
  0x1e   :  { %p2761_p0 = por %p2760_p13, %p2759_p12 }
  0x20   :  { %p2762_p1 = pnand %p2761_p0, %p2755_p11 }
  0x22   :  { %2765 = shalt.err (!%p2762_p1)
}
  0x23   :  { %22 = dma.hbm_to_vmem [thread:$0]  %s2921_s0, 448, %s20_s8, [#allocation3]  }
  0x24   :  { %s2766_s22 = scalar_lea.hbm %s2924_s3, 4096 }
  0x25   :  { %p2767_p2 = scmp.ne.s32.totalorder %s2924_s3, %s2766_s22  ;;  %p2770_p3 = scmp.lt.u32.totalorder %s2766_s22, %s2924_s3 }
  0x27   :  { %p2772_p4 = pnand %p2770_p3, %p2767_p2 }
  0x29   :  { %2775 = shalt.err (!%p2772_p4)
}
  0x2a   :  { %s2776_s27 = scalar_lea.vmem %s43_s10, 4096  ;;  %p2781_p6 = scmp.lt.s32.totalorder %s43_s10, %s43_s10 }
  0x2b   :  { %p2777_p5 = scmp.ne.s32.totalorder %s43_s10, %s2776_s27  ;;  %p2782_p7 = scmp.lt.s32.totalorder %s2776_s27, %s2776_s27 }
  0x2d   :  { %p2783_p8 = por %p2782_p7, %p2781_p6 }
  0x2f   :  { %p2784_p9 = pnand %p2783_p8, %p2777_p5 }
  0x31   :  { %2787 = shalt.err (!%p2784_p9)
}
  0x32   :  { %s2821_s0 = smov 64   ;;  %s2822_s28 = smov 4  }
  0x33   :  { %48 = dma.hbm_to_vmem [thread:$0]  %s2924_s3, 4096, %s43_s10, [#allocation6], %s2821_s0, %s2821_s0, %s2822_s28  }
  0x34   :  { %2810 = dma.done.wait [#allocation3], 448  }
  0x35   :  { %2811 = vsyncadd [#allocation3], 4294966848 }
  0x36   :  { %2812 = dma.done.wait [#allocation6], 29952  }
  0x37   :  { %2813 = vsyncadd [#allocation6], 4294937344  ;;  %v2367_v0 = vld [vmem:[#allocation5 + $0x4] ss:$16 sps:$4 sm:$0xff]   ;;  %v2369_v1 = vld [vmem:[#allocation5 + $0xc] ss:$16 sps:$4 sm:$0xff]  }
  0x38   :  { %1340 = vmatprep.subr.bf16.mxu0 %v2367_v0  ;;  %v2371_v2 = vld [vmem:[#allocation5] ss:$16 sps:$4 sm:$0xff]   ;;  %v2372_v3 = vld [vmem:[#allocation5 + $0x8] ss:$16 sps:$4 sm:$0xff]   ;;  %1504 = vmatprep.subr.bf16.mxu1 %v2369_v1  ;;  %v2373_v4 = vld [vmem:[#allocation5 + $0x24] ss:$16 sps:$4 sm:$0xff]  }
  0x39   :  { %1341 = vmatpush1.bf16.msra.mxu0 %v2371_v2  ;;  %1505 = vmatpush1.bf16.msra.mxu1 %v2372_v3  ;;  %v2375_v5 = vld [vmem:[#allocation5 + $0x2c] ss:$16 sps:$4 sm:$0xff]   ;;  %v2377_v6 = vld [vmem:[#allocation5 + $0x20] ss:$16 sps:$4 sm:$0xff]   ;;  %v2378_v7 = vld [vmem:[#allocation5 + $0x28] ss:$16 sps:$4 sm:$0xff]  }
  0x3a   :  { %1342 = vmatprep.subr.bf16.mxu0 %v2373_v4  ;;  %1506 = vmatprep.subr.bf16.mxu1 %v2375_v5  ;;  %v2379_v8 = vld [vmem:[#allocation5 + $0x44] ss:$16 sps:$4 sm:$0xff]   ;;  %v2381_v9 = vld [vmem:[#allocation5 + $0x4c] ss:$16 sps:$4 sm:$0xff]   ;;  %v2383_v10 = vld [vmem:[#allocation5 + $0x40] ss:$16 sps:$4 sm:$0xff]  }
  0x3b   :  { %v2384_v11 = vld [vmem:[#allocation5 + $0x48] ss:$16 sps:$4 sm:$0xff]   ;;  %v2385_v12 = vld [vmem:[#allocation5 + $0x64] ss:$16 sps:$4 sm:$0xff]   ;;  %v2387_v13 = vld [vmem:[#allocation5 + $0x6c] ss:$16 sps:$4 sm:$0xff]  }
  0x3c   :  { %v2389_v14 = vld [vmem:[#allocation5 + $0x60] ss:$16 sps:$4 sm:$0xff]   ;;  %v2390_v15 = vld [vmem:[#allocation5 + $0x68] ss:$16 sps:$4 sm:$0xff]   ;;  %v2391_v16 = vld [vmem:[#allocation5 + $0x84] ss:$16 sps:$4 sm:$0xff]  }
  0x3d   :  { %1343 = vmatpush1.bf16.msra.mxu0 %v2377_v6  ;;  %1507 = vmatpush1.bf16.msra.mxu1 %v2378_v7  ;;  %v2393_v17 = vld [vmem:[#allocation5 + $0x8c] ss:$16 sps:$4 sm:$0xff]   ;;  %v2395_v18 = vld [vmem:[#allocation5 + $0x80] ss:$16 sps:$4 sm:$0xff]   ;;  %v2396_v19 = vld [vmem:[#allocation5 + $0x88] ss:$16 sps:$4 sm:$0xff]  }
  0x3e   :  { %1344 = vmatprep.subr.bf16.mxu0 %v2379_v8  ;;  %1508 = vmatprep.subr.bf16.mxu1 %v2381_v9  ;;  %v2397_v20 = vld [vmem:[#allocation5 + $0xa4] ss:$16 sps:$4 sm:$0xff]   ;;  %v2399_v21 = vld [vmem:[#allocation5 + $0xac] ss:$16 sps:$4 sm:$0xff]   ;;  %v2401_v22 = vld [vmem:[#allocation5 + $0xa0] ss:$16 sps:$4 sm:$0xff]  }
  0x3f   :  { %v2402_v23 = vld [vmem:[#allocation5 + $0xa8] ss:$16 sps:$4 sm:$0xff]   ;;  %v2403_v24 = vld [vmem:[#allocation5 + $0xc4] ss:$16 sps:$4 sm:$0xff]   ;;  %v2405_v25 = vld [vmem:[#allocation5 + $0xcc] ss:$16 sps:$4 sm:$0xff]  }
  0x40   :  { %v2407_v26 = vld [vmem:[#allocation5 + $0xc0] ss:$16 sps:$4 sm:$0xff]   ;;  %v2408_v27 = vld [vmem:[#allocation5 + $0xc8] ss:$16 sps:$4 sm:$0xff]   ;;  %v2409_v28 = vld [vmem:[#allocation5 + $0xe4] ss:$16 sps:$4 sm:$0xff]  }
  0x41   :  { %1345 = vmatpush1.bf16.msra.mxu0 %v2383_v10  ;;  %1509 = vmatpush1.bf16.msra.mxu1 %v2384_v11  ;;  %v2411_v29 = vld [vmem:[#allocation5 + $0xec] ss:$16 sps:$4 sm:$0xff]   ;;  %v2413_v30 = vld [vmem:[#allocation5 + $0xe0] ss:$16 sps:$4 sm:$0xff]   ;;  %v2414_v31 = vld [vmem:[#allocation5 + $0xe8] ss:$16 sps:$4 sm:$0xff]  }
  0x42   :  { %1346 = vmatprep.subr.bf16.mxu0 %v2385_v12  ;;  %1510 = vmatprep.subr.bf16.mxu1 %v2387_v13  ;;  %v2415_v32 = vld [vmem:[#allocation5 + $0x104] ss:$16 sps:$4 sm:$0xff]   ;;  %v2417_v33 = vld [vmem:[#allocation5 + $0x10c] ss:$16 sps:$4 sm:$0xff]   ;;  %v2419_v34 = vld [vmem:[#allocation5 + $0x100] ss:$16 sps:$4 sm:$0xff]  }
  0x43   :  { %v2420_v35 = vld [vmem:[#allocation5 + $0x108] ss:$16 sps:$4 sm:$0xff]   ;;  %v2421_v36 = vld [vmem:[#allocation5 + $0x124] ss:$16 sps:$4 sm:$0xff]   ;;  %v2423_v37 = vld [vmem:[#allocation5 + $0x12c] ss:$16 sps:$4 sm:$0xff]  }
  0x44   :  { %v2425_v38 = vld [vmem:[#allocation5 + $0x120] ss:$16 sps:$4 sm:$0xff]   ;;  %v2426_v39 = vld [vmem:[#allocation5 + $0x128] ss:$16 sps:$4 sm:$0xff]   ;;  %v2427_v40 = vld [vmem:[#allocation5 + $0x144] ss:$16 sps:$4 sm:$0xff]  }
  0x45   :  { %1347 = vmatpush1.bf16.msra.mxu0 %v2389_v14  ;;  %1511 = vmatpush1.bf16.msra.mxu1 %v2390_v15  ;;  %v2429_v41 = vld [vmem:[#allocation5 + $0x14c] ss:$16 sps:$4 sm:$0xff]   ;;  %v2431_v42 = vld [vmem:[#allocation5 + $0x140] ss:$16 sps:$4 sm:$0xff]   ;;  %v2432_v43 = vld [vmem:[#allocation5 + $0x148] ss:$16 sps:$4 sm:$0xff]  }
  0x46   :  { %1348 = vmatprep.subr.bf16.mxu0 %v2391_v16  ;;  %1512 = vmatprep.subr.bf16.mxu1 %v2393_v17  ;;  %v2433_v44 = vld [vmem:[#allocation5 + $0x164] ss:$16 sps:$4 sm:$0xff]   ;;  %v2435_v45 = vld [vmem:[#allocation5 + $0x16c] ss:$16 sps:$4 sm:$0xff]   ;;  %v2437_v47 = vld [vmem:[#allocation5 + $0x160] ss:$16 sps:$4 sm:$0xff]  }
  0x47   :  { %v61_v46 = vld [vmem:[#allocation2] sm:$0xff]  ;;  %v2441_v51 = vld [vmem:[#allocation5 + $0x18c] ss:$16 sps:$4 sm:$0xff]   ;;  %v2443_v52 = vld [vmem:[#allocation5 + $0x180] ss:$16 sps:$4 sm:$0xff]   ;;  %vm1327_vm0 = vcmask 1040384  }
  0x48   :  { %v2039_v48 = vcombine.high %v61_v46, %v61_v46  ;;  %v2438_v49 = vld [vmem:[#allocation5 + $0x168] ss:$16 sps:$4 sm:$0xff]   ;;  %v2439_v50 = vld [vmem:[#allocation5 + $0x184] ss:$16 sps:$4 sm:$0xff]   ;;  %v2447_v55 = vld [vmem:[#allocation5 + $0x1ac] ss:$16 sps:$4 sm:$0xff]   ;;  %v2038_v4 = vcombine.low %v61_v46, %v61_v46 }
  0x49   :  { %1349 = vmatpush1.bf16.msra.mxu0 %v2395_v18  ;;  %1513 = vmatpush1.bf16.msra.mxu1 %v2396_v19  ;;  %v2444_v53 = vld [vmem:[#allocation5 + $0x188] ss:$16 sps:$4 sm:$0xff]   ;;  %v2445_v54 = vld [vmem:[#allocation5 + $0x1a4] ss:$16 sps:$4 sm:$0xff]   ;;  %v2449_v56 = vld [vmem:[#allocation5 + $0x1a0] ss:$16 sps:$4 sm:$0xff]  }
  0x4a   :  { %1350 = vmatprep.subr.bf16.mxu0 %v2397_v20  ;;  %1514 = vmatprep.subr.bf16.mxu1 %v2399_v21  ;;  %v2450_v57 = vld [vmem:[#allocation5 + $0x1a8] ss:$16 sps:$4 sm:$0xff]   ;;  %v2451_v58 = vld [vmem:[#allocation5 + $0x1c4] ss:$16 sps:$4 sm:$0xff]   ;;  %v2453_v59 = vld [vmem:[#allocation5 + $0x1cc] ss:$16 sps:$4 sm:$0xff]  }
  0x4b   :  { %1372 = vmatprep.mubr.bf16.mxu0 %v2039_v48  ;;  %1536 = vmatprep.mubr.bf16.mxu1 %v2039_v48  ;;  %v2455_v60 = vld [vmem:[#allocation5 + $0x1c0] ss:$16 sps:$4 sm:$0xff]   ;;  %v2456_v61 = vld [vmem:[#allocation5 + $0x1c8] ss:$16 sps:$4 sm:$0xff]   ;;  %v2457_v62 = vld [vmem:[#allocation5 + $0x1e4] ss:$16 sps:$4 sm:$0xff]  }
  0x4c   :  { %v2459_v63 = vld [vmem:[#allocation5 + $0x1ec] ss:$16 sps:$4 sm:$0xff]   ;;  %v2461_v0 = vld [vmem:[#allocation5 + $0x1e0] ss:$16 sps:$4 sm:$0xff]   ;;  %v2462_v1 = vld [vmem:[#allocation5 + $0x1e8] ss:$16 sps:$4 sm:$0xff]  }
  0x4d   :  { %1351 = vmatpush1.bf16.msra.mxu0 %v2401_v22  ;;  %1515 = vmatpush1.bf16.msra.mxu1 %v2402_v23  ;;  %v2467_v2 = vld [vmem:[#allocation5 + $0x204] ss:$16 sps:$4 sm:$0xff]   ;;  %v2470_v3 = vld [vmem:[#allocation5 + $0x20c] ss:$16 sps:$4 sm:$0xff]   ;;  %v2465_v5 = vld [vmem:[#allocation5 + $0x200] ss:$16 sps:$4 sm:$0xff]  }
  0x4e   :  { %1352 = vmatprep.subr.bf16.mxu0 %v2403_v24  ;;  %1516 = vmatprep.subr.bf16.mxu1 %v2405_v25  ;;  %v2468_v6 = vld [vmem:[#allocation5 + $0x208] ss:$16 sps:$4 sm:$0xff]   ;;  %v2473_v7 = vld [vmem:[#allocation5 + $0x224] ss:$16 sps:$4 sm:$0xff]   ;;  %v2476_v8 = vld [vmem:[#allocation5 + $0x22c] ss:$16 sps:$4 sm:$0xff]  }
  0x4f   :  { %v2471_v9 = vld [vmem:[#allocation5 + $0x220] ss:$16 sps:$4 sm:$0xff]   ;;  %v2474_v10 = vld [vmem:[#allocation5 + $0x228] ss:$16 sps:$4 sm:$0xff]   ;;  %v2479_v11 = vld [vmem:[#allocation5 + $0x244] ss:$16 sps:$4 sm:$0xff]  }
  0x50   :  { %v2482_v12 = vld [vmem:[#allocation5 + $0x24c] ss:$16 sps:$4 sm:$0xff]   ;;  %v2477_v13 = vld [vmem:[#allocation5 + $0x240] ss:$16 sps:$4 sm:$0xff]   ;;  %v2480_v14 = vld [vmem:[#allocation5 + $0x248] ss:$16 sps:$4 sm:$0xff]  }
  0x51   :  { %1353 = vmatpush1.bf16.msra.mxu0 %v2407_v26  ;;  %1517 = vmatpush1.bf16.msra.mxu1 %v2408_v27  ;;  %v2485_v15 = vld [vmem:[#allocation5 + $0x264] ss:$16 sps:$4 sm:$0xff]   ;;  %v2488_v16 = vld [vmem:[#allocation5 + $0x26c] ss:$16 sps:$4 sm:$0xff]   ;;  %v2483_v17 = vld [vmem:[#allocation5 + $0x260] ss:$16 sps:$4 sm:$0xff]  }
  0x52   :  { %1354 = vmatprep.subr.bf16.mxu0 %v2409_v28  ;;  %1518 = vmatprep.subr.bf16.mxu1 %v2411_v29  ;;  %v2486_v18 = vld [vmem:[#allocation5 + $0x268] ss:$16 sps:$4 sm:$0xff]   ;;  %v2491_v19 = vld [vmem:[#allocation5 + $0x284] ss:$16 sps:$4 sm:$0xff]   ;;  %v2494_v20 = vld [vmem:[#allocation5 + $0x28c] ss:$16 sps:$4 sm:$0xff]  }
  0x53   :  { %v2489_v21 = vld [vmem:[#allocation5 + $0x280] ss:$16 sps:$4 sm:$0xff]   ;;  %v2492_v22 = vld [vmem:[#allocation5 + $0x288] ss:$16 sps:$4 sm:$0xff]   ;;  %v2497_v23 = vld [vmem:[#allocation5 + $0x2a4] ss:$16 sps:$4 sm:$0xff]  }
  0x54   :  { %v2500_v24 = vld [vmem:[#allocation5 + $0x2ac] ss:$16 sps:$4 sm:$0xff]   ;;  %v2495_v25 = vld [vmem:[#allocation5 + $0x2a0] ss:$16 sps:$4 sm:$0xff]   ;;  %v2498_v26 = vld [vmem:[#allocation5 + $0x2a8] ss:$16 sps:$4 sm:$0xff]  }
  0x55   :  { %1355 = vmatpush1.bf16.msra.mxu0 %v2413_v30  ;;  %1519 = vmatpush1.bf16.msra.mxu1 %v2414_v31  ;;  %v2503_v27 = vld [vmem:[#allocation5 + $0x2c4] ss:$16 sps:$4 sm:$0xff]   ;;  %v2506_v28 = vld [vmem:[#allocation5 + $0x2cc] ss:$16 sps:$4 sm:$0xff]   ;;  %v2501_v31 = vld [vmem:[#allocation5 + $0x2c0] ss:$16 sps:$4 sm:$0xff]  }
  0x56   :  { %1356 = vmatprep.subr.bf16.mxu0 %v2415_v32  ;;  %1520 = vmatprep.subr.bf16.mxu1 %v2417_v33  ;;  %v2891_v29 = vld [vmem:[#allocation2 + $0x8] sm:$0xff]  ;;  %v2504_v32 = vld [vmem:[#allocation5 + $0x2c8] ss:$16 sps:$4 sm:$0xff]   ;;  %v2509_v33 = vld [vmem:[#allocation5 + $0x2e4] ss:$16 sps:$4 sm:$0xff]   ;;  %vm1323_vm1 = vcmask 277504  }
  0x57   :  { %v2041_v30 = vcombine.high %v2891_v29, %v2891_v29  ;;  %v2530_v46 = vld [vmem:[#allocation5 + $0x34c] ss:$16 sps:$4 sm:$0xff]   ;;  %v2528_v48 = vld [vmem:[#allocation5 + $0x348] ss:$16 sps:$4 sm:$0xff]   ;;  %s2824_s8 = smov [#allocation8]  }
  0x58   :  { %s2028_s9 = sshll.u32 %s2824_s8, 4  ;;  %s2029_s9 = int_to_ptr.vmem [resolvable:$true] %s2028_s9 }
  0x59   :  { %1357 = vmatpush1.bf16.msra.mxu0 %v2419_v34  ;;  %1521 = vmatpush1.bf16.msra.mxu1 %v2420_v35  ;;  %v2512_v34 = vld [vmem:[#allocation5 + $0x2ec] ss:$16 sps:$4 sm:$0xff]   ;;  %v2507_v35 = vld [vmem:[#allocation5 + $0x2e0] ss:$16 sps:$4 sm:$0xff]   ;;  %s2788_s10 = scalar_lea.vmem %s2029_s9, 128  ;;  %p2793_p11 = scmp.lt.s32.totalorder %s2029_s9, %s2029_s9 }
  0x5a   :  { %1358 = vmatprep.subr.bf16.mxu0 %v2421_v36  ;;  %1522 = vmatprep.subr.bf16.mxu1 %v2423_v37  ;;  %v2510_v36 = vld [vmem:[#allocation5 + $0x2e8] ss:$16 sps:$4 sm:$0xff]   ;;  %v2515_v37 = vld [vmem:[#allocation5 + $0x304] ss:$16 sps:$4 sm:$0xff]   ;;  %p2789_p10 = scmp.ne.s32.totalorder %s2029_s9, %s2788_s10  ;;  %p2794_p12 = scmp.lt.s32.totalorder %s2788_s10, %s2788_s10 }
  0x5c   :  { %p2795_p13 = por %p2794_p12, %p2793_p11 }
  0x5d   :  { %1359 = vmatpush1.bf16.msra.mxu0 %v2425_v38  ;;  %1523 = vmatpush1.bf16.msra.mxu1 %v2426_v39  ;;  %v2518_v38 = vld [vmem:[#allocation5 + $0x30c] ss:$16 sps:$4 sm:$0xff]   ;;  %v2513_v39 = vld [vmem:[#allocation5 + $0x300] ss:$16 sps:$4 sm:$0xff]  }
  0x5e   :  { %1360 = vmatprep.subr.bf16.mxu0 %v2427_v40  ;;  %1524 = vmatprep.subr.bf16.mxu1 %v2429_v41  ;;  %v2516_v40 = vld [vmem:[#allocation5 + $0x308] ss:$16 sps:$4 sm:$0xff]   ;;  %v2521_v41 = vld [vmem:[#allocation5 + $0x324] ss:$16 sps:$4 sm:$0xff]   ;;  %p2796_p0 = pnand %p2795_p13, %p2789_p10 }
  0x61   :  { %1361 = vmatpush1.bf16.msra.mxu0 %v2431_v42  ;;  %1525 = vmatpush1.bf16.msra.mxu1 %v2432_v43  ;;  %v2524_v42 = vld [vmem:[#allocation5 + $0x32c] ss:$16 sps:$4 sm:$0xff]   ;;  %v2519_v43 = vld [vmem:[#allocation5 + $0x320] ss:$16 sps:$4 sm:$0xff]  }
  0x62   :  { %1362 = vmatprep.subr.bf16.mxu0 %v2433_v44  ;;  %1526 = vmatprep.subr.bf16.mxu1 %v2435_v45  ;;  %v2522_v44 = vld [vmem:[#allocation5 + $0x328] ss:$16 sps:$4 sm:$0xff]   ;;  %v2527_v45 = vld [vmem:[#allocation5 + $0x344] ss:$16 sps:$4 sm:$0xff]  }
  0x65   :  { %1363 = vmatpush1.bf16.msra.mxu0 %v2437_v47  ;;  %1527 = vmatpush1.bf16.msra.mxu1 %v2438_v49  ;;  %v2525_v47 = vld [vmem:[#allocation5 + $0x340] ss:$16 sps:$4 sm:$0xff]   ;;  %v2533_v49 = vld [vmem:[#allocation5 + $0x364] ss:$16 sps:$4 sm:$0xff]  }
  0x66   :  { %1364 = vmatprep.subr.bf16.mxu0 %v2439_v50  ;;  %1528 = vmatprep.subr.bf16.mxu1 %v2441_v51  ;;  %v2536_v50 = vld [vmem:[#allocation5 + $0x36c] ss:$16 sps:$4 sm:$0xff]   ;;  %v2531_v51 = vld [vmem:[#allocation5 + $0x360] ss:$16 sps:$4 sm:$0xff]  }
  0x69   :  { %1365 = vmatpush1.bf16.msra.mxu0 %v2443_v52  ;;  %1529 = vmatpush1.bf16.msra.mxu1 %v2444_v53  ;;  %v2534_v52 = vld [vmem:[#allocation5 + $0x368] ss:$16 sps:$4 sm:$0xff]   ;;  %v2539_v53 = vld [vmem:[#allocation5 + $0x384] ss:$16 sps:$4 sm:$0xff]  }
  0x6a   :  { %1366 = vmatprep.subr.bf16.mxu0 %v2445_v54  ;;  %1530 = vmatprep.subr.bf16.mxu1 %v2447_v55  ;;  %v2542_v54 = vld [vmem:[#allocation5 + $0x38c] ss:$16 sps:$4 sm:$0xff]   ;;  %v2537_v55 = vld [vmem:[#allocation5 + $0x380] ss:$16 sps:$4 sm:$0xff]  }
  0x6d   :  { %1367 = vmatpush1.bf16.msra.mxu0 %v2449_v56  ;;  %1531 = vmatpush1.bf16.msra.mxu1 %v2450_v57  ;;  %v2540_v56 = vld [vmem:[#allocation5 + $0x388] ss:$16 sps:$4 sm:$0xff]   ;;  %v2545_v57 = vld [vmem:[#allocation5 + $0x3a4] ss:$16 sps:$4 sm:$0xff]  }
  0x6e   :  { %1368 = vmatprep.subr.bf16.mxu0 %v2451_v58  ;;  %1532 = vmatprep.subr.bf16.mxu1 %v2453_v59  ;;  %v2548_v58 = vld [vmem:[#allocation5 + $0x3ac] ss:$16 sps:$4 sm:$0xff]   ;;  %v2543_v59 = vld [vmem:[#allocation5 + $0x3a0] ss:$16 sps:$4 sm:$0xff]  }
  0x71   :  { %1369 = vmatpush1.bf16.msra.mxu0 %v2455_v60  ;;  %1533 = vmatpush1.bf16.msra.mxu1 %v2456_v61  ;;  %v2546_v60 = vld [vmem:[#allocation5 + $0x3a8] ss:$16 sps:$4 sm:$0xff]   ;;  %v2551_v61 = vld [vmem:[#allocation5 + $0x3c4] ss:$16 sps:$4 sm:$0xff]  }
  0x72   :  { %1370 = vmatprep.subr.bf16.mxu0 %v2457_v62  ;;  %1534 = vmatprep.subr.bf16.mxu1 %v2459_v63  ;;  %v2554_v62 = vld [vmem:[#allocation5 + $0x3cc] ss:$16 sps:$4 sm:$0xff]   ;;  %v2549_v63 = vld [vmem:[#allocation5 + $0x3c0] ss:$16 sps:$4 sm:$0xff]  }
  0x75   :  { %1371 = vmatpush1.bf16.msra.mxu0 %v2461_v0  ;;  %1535 = vmatpush1.bf16.msra.mxu1 %v2462_v1  ;;  %v2552_v0 = vld [vmem:[#allocation5 + $0x3c8] ss:$16 sps:$4 sm:$0xff]   ;;  %v2557_v1 = vld [vmem:[#allocation5 + $0x3e4] ss:$16 sps:$4 sm:$0xff]  }
  0x76   :  { %1381 = vmatprep.subr.bf16.mxu0 %v2467_v2  ;;  %1545 = vmatprep.subr.bf16.mxu1 %v2470_v3  ;;  %v2560_v2 = vld [vmem:[#allocation5 + $0x3ec] ss:$16 sps:$4 sm:$0xff]   ;;  %v2555_v3 = vld [vmem:[#allocation5 + $0x3e0] ss:$16 sps:$4 sm:$0xff]  }
  0x78   :  { %1373 = vmatmul.mubr.bf16.vlgmr.msra.gmra.mrb[0].mxu0 %v2038_v4  ;;  %1537 = vmatmul.mubr.bf16.vlgmr.msra.gmra.mrb[0].mxu1 %v2038_v4  ;;  %v2558_v4 = vld [vmem:[#allocation5 + $0x3e8] ss:$16 sps:$4 sm:$0xff]  }
  0x79   :  { %1382 = vmatpush1.bf16.msra.mxu0 %v2465_v5  ;;  %1546 = vmatpush1.bf16.msra.mxu1 %v2468_v6  ;;  %v2565_v5 = vld [vmem:[#allocation5 + $0x404] ss:$16 sps:$4 sm:$0xff]   ;;  %v2568_v6 = vld [vmem:[#allocation5 + $0x40c] ss:$16 sps:$4 sm:$0xff]  }
  0x7a   :  { %1383 = vmatprep.subr.bf16.mxu0 %v2473_v7  ;;  %1547 = vmatprep.subr.bf16.mxu1 %v2476_v8  ;;  %v2040_v7 = vcombine.low %v2891_v29, %v2891_v29  ;;  %v2563_v8 = vld [vmem:[#allocation5 + $0x400] ss:$16 sps:$4 sm:$0xff]   ;;  %v2598_v29 = vld [vmem:[#allocation5 + $0x4ac] ss:$16 sps:$4 sm:$0xff]  }
  0x7b   :  { %1413 = vmatprep.mubr.bf16.mxu0 %v2041_v30  ;;  %1577 = vmatprep.mubr.bf16.mxu1 %v2041_v30  ;;  %v2593_v30 = vld [vmem:[#allocation5 + $0x4a0] ss:$16 sps:$4 sm:$0xff]  }
  0x7d   :  { %1384 = vmatpush1.bf16.msra.mxu0 %v2471_v9  ;;  %1548 = vmatpush1.bf16.msra.mxu1 %v2474_v10  ;;  %v2566_v9 = vld [vmem:[#allocation5 + $0x408] ss:$16 sps:$4 sm:$0xff]   ;;  %v2571_v10 = vld [vmem:[#allocation5 + $0x424] ss:$16 sps:$4 sm:$0xff]  }
  0x7e   :  { %1385 = vmatprep.subr.bf16.mxu0 %v2479_v11  ;;  %1549 = vmatprep.subr.bf16.mxu1 %v2482_v12  ;;  %v2897_v11 = vld [vmem:[#allocation2 + $0x10] sm:$0xff]  ;;  %v2574_v12 = vld [vmem:[#allocation5 + $0x42c] ss:$16 sps:$4 sm:$0xff]  }
  0x81   :  { %1386 = vmatpush1.bf16.msra.mxu0 %v2477_v13  ;;  %1550 = vmatpush1.bf16.msra.mxu1 %v2480_v14  ;;  %v2043_v13 = vcombine.high %v2897_v11, %v2897_v11  ;;  %v2569_v14 = vld [vmem:[#allocation5 + $0x420] ss:$16 sps:$4 sm:$0xff]  }
  0x82   :  { %1387 = vmatprep.subr.bf16.mxu0 %v2485_v15  ;;  %1551 = vmatprep.subr.bf16.mxu1 %v2488_v16  ;;  %v2572_v15 = vld [vmem:[#allocation5 + $0x428] ss:$16 sps:$4 sm:$0xff]   ;;  %v2577_v16 = vld [vmem:[#allocation5 + $0x444] ss:$16 sps:$4 sm:$0xff]  }
  0x85   :  { %1388 = vmatpush1.bf16.msra.mxu0 %v2483_v17  ;;  %1552 = vmatpush1.bf16.msra.mxu1 %v2486_v18  ;;  %v2580_v17 = vld [vmem:[#allocation5 + $0x44c] ss:$16 sps:$4 sm:$0xff]   ;;  %v2575_v18 = vld [vmem:[#allocation5 + $0x440] ss:$16 sps:$4 sm:$0xff]  }
  0x86   :  { %1389 = vmatprep.subr.bf16.mxu0 %v2491_v19  ;;  %1553 = vmatprep.subr.bf16.mxu1 %v2494_v20  ;;  %v2578_v19 = vld [vmem:[#allocation5 + $0x448] ss:$16 sps:$4 sm:$0xff]   ;;  %v2583_v20 = vld [vmem:[#allocation5 + $0x464] ss:$16 sps:$4 sm:$0xff]  }
  0x89   :  { %1390 = vmatpush1.bf16.msra.mxu0 %v2489_v21  ;;  %1554 = vmatpush1.bf16.msra.mxu1 %v2492_v22  ;;  %v2586_v21 = vld [vmem:[#allocation5 + $0x46c] ss:$16 sps:$4 sm:$0xff]   ;;  %v2581_v22 = vld [vmem:[#allocation5 + $0x460] ss:$16 sps:$4 sm:$0xff]  }
  0x8a   :  { %1391 = vmatprep.subr.bf16.mxu0 %v2497_v23  ;;  %1555 = vmatprep.subr.bf16.mxu1 %v2500_v24  ;;  %v2584_v23 = vld [vmem:[#allocation5 + $0x468] ss:$16 sps:$4 sm:$0xff]   ;;  %v2589_v24 = vld [vmem:[#allocation5 + $0x484] ss:$16 sps:$4 sm:$0xff]  }
  0x8d   :  { %1392 = vmatpush1.bf16.msra.mxu0 %v2495_v25  ;;  %1556 = vmatpush1.bf16.msra.mxu1 %v2498_v26  ;;  %v2592_v25 = vld [vmem:[#allocation5 + $0x48c] ss:$16 sps:$4 sm:$0xff]   ;;  %v2587_v26 = vld [vmem:[#allocation5 + $0x480] ss:$16 sps:$4 sm:$0xff]  }
  0x8e   :  { %1393 = vmatprep.subr.bf16.mxu0 %v2503_v27  ;;  %1557 = vmatprep.subr.bf16.mxu1 %v2506_v28  ;;  %v2590_v27 = vld [vmem:[#allocation5 + $0x488] ss:$16 sps:$4 sm:$0xff]   ;;  %v2595_v28 = vld [vmem:[#allocation5 + $0x4a4] ss:$16 sps:$4 sm:$0xff]  }
  0x91   :  { %1394 = vmatpush1.bf16.msra.mxu0 %v2501_v31  ;;  %1558 = vmatpush1.bf16.msra.mxu1 %v2504_v32  ;;  %v2596_v31 = vld [vmem:[#allocation5 + $0x4a8] ss:$16 sps:$4 sm:$0xff]   ;;  %v2601_v32 = vld [vmem:[#allocation5 + $0x4c4] ss:$16 sps:$4 sm:$0xff]  }
  0x92   :  { %1395 = vmatprep.subr.bf16.mxu0 %v2509_v33  ;;  %1559 = vmatprep.subr.bf16.mxu1 %v2512_v34  ;;  %v2604_v33 = vld [vmem:[#allocation5 + $0x4cc] ss:$16 sps:$4 sm:$0xff]   ;;  %v2599_v34 = vld [vmem:[#allocation5 + $0x4c0] ss:$16 sps:$4 sm:$0xff]  }
  0x95   :  { %1396 = vmatpush1.bf16.msra.mxu0 %v2507_v35  ;;  %1560 = vmatpush1.bf16.msra.mxu1 %v2510_v36  ;;  %v2602_v35 = vld [vmem:[#allocation5 + $0x4c8] ss:$16 sps:$4 sm:$0xff]   ;;  %v2607_v36 = vld [vmem:[#allocation5 + $0x4e4] ss:$16 sps:$4 sm:$0xff]  }
  0x96   :  { %1397 = vmatprep.subr.bf16.mxu0 %v2515_v37  ;;  %1561 = vmatprep.subr.bf16.mxu1 %v2518_v38  ;;  %v2610_v37 = vld [vmem:[#allocation5 + $0x4ec] ss:$16 sps:$4 sm:$0xff]   ;;  %v2605_v38 = vld [vmem:[#allocation5 + $0x4e0] ss:$16 sps:$4 sm:$0xff]  }
  0x99   :  { %1398 = vmatpush1.bf16.msra.mxu0 %v2513_v39  ;;  %1562 = vmatpush1.bf16.msra.mxu1 %v2516_v40  ;;  %v2608_v39 = vld [vmem:[#allocation5 + $0x4e8] ss:$16 sps:$4 sm:$0xff]   ;;  %v2613_v40 = vld [vmem:[#allocation5 + $0x504] ss:$16 sps:$4 sm:$0xff]  }
  0x9a   :  { %1399 = vmatprep.subr.bf16.mxu0 %v2521_v41  ;;  %1563 = vmatprep.subr.bf16.mxu1 %v2524_v42  ;;  %v2616_v41 = vld [vmem:[#allocation5 + $0x50c] ss:$16 sps:$4 sm:$0xff]   ;;  %v2611_v42 = vld [vmem:[#allocation5 + $0x500] ss:$16 sps:$4 sm:$0xff]  }
  0x9d   :  { %1400 = vmatpush1.bf16.msra.mxu0 %v2519_v43  ;;  %1564 = vmatpush1.bf16.msra.mxu1 %v2522_v44  ;;  %v2614_v43 = vld [vmem:[#allocation5 + $0x508] ss:$16 sps:$4 sm:$0xff]   ;;  %v2619_v44 = vld [vmem:[#allocation5 + $0x524] ss:$16 sps:$4 sm:$0xff]  }
  0x9e   :  { %1401 = vmatprep.subr.bf16.mxu0 %v2527_v45  ;;  %1565 = vmatprep.subr.bf16.mxu1 %v2530_v46  ;;  %v2622_v45 = vld [vmem:[#allocation5 + $0x52c] ss:$16 sps:$4 sm:$0xff]   ;;  %v2617_v46 = vld [vmem:[#allocation5 + $0x520] ss:$16 sps:$4 sm:$0xff]  }
  0xa1   :  { %1402 = vmatpush1.bf16.msra.mxu0 %v2525_v47  ;;  %1566 = vmatpush1.bf16.msra.mxu1 %v2528_v48  ;;  %v2620_v47 = vld [vmem:[#allocation5 + $0x528] ss:$16 sps:$4 sm:$0xff]   ;;  %v2625_v48 = vld [vmem:[#allocation5 + $0x544] ss:$16 sps:$4 sm:$0xff]  }
  0xa2   :  { %1403 = vmatprep.subr.bf16.mxu0 %v2533_v49  ;;  %1567 = vmatprep.subr.bf16.mxu1 %v2536_v50  ;;  %v2628_v49 = vld [vmem:[#allocation5 + $0x54c] ss:$16 sps:$4 sm:$0xff]   ;;  %v2623_v50 = vld [vmem:[#allocation5 + $0x540] ss:$16 sps:$4 sm:$0xff]  }
  0xa5   :  { %1404 = vmatpush1.bf16.msra.mxu0 %v2531_v51  ;;  %1568 = vmatpush1.bf16.msra.mxu1 %v2534_v52  ;;  %v2626_v51 = vld [vmem:[#allocation5 + $0x548] ss:$16 sps:$4 sm:$0xff]   ;;  %v2631_v52 = vld [vmem:[#allocation5 + $0x564] ss:$16 sps:$4 sm:$0xff]  }
  0xa6   :  { %1405 = vmatprep.subr.bf16.mxu0 %v2539_v53  ;;  %1569 = vmatprep.subr.bf16.mxu1 %v2542_v54  ;;  %v2634_v53 = vld [vmem:[#allocation5 + $0x56c] ss:$16 sps:$4 sm:$0xff]   ;;  %v2629_v54 = vld [vmem:[#allocation5 + $0x560] ss:$16 sps:$4 sm:$0xff]  }
  0xa9   :  { %1406 = vmatpush1.bf16.msra.mxu0 %v2537_v55  ;;  %1570 = vmatpush1.bf16.msra.mxu1 %v2540_v56  ;;  %v2632_v55 = vld [vmem:[#allocation5 + $0x568] ss:$16 sps:$4 sm:$0xff]   ;;  %v2637_v56 = vld [vmem:[#allocation5 + $0x584] ss:$16 sps:$4 sm:$0xff]  }
  0xaa   :  { %1407 = vmatprep.subr.bf16.mxu0 %v2545_v57  ;;  %1571 = vmatprep.subr.bf16.mxu1 %v2548_v58  ;;  %v2640_v57 = vld [vmem:[#allocation5 + $0x58c] ss:$16 sps:$4 sm:$0xff]   ;;  %v2635_v58 = vld [vmem:[#allocation5 + $0x580] ss:$16 sps:$4 sm:$0xff]  }
  0xad   :  { %1408 = vmatpush1.bf16.msra.mxu0 %v2543_v59  ;;  %1572 = vmatpush1.bf16.msra.mxu1 %v2546_v60  ;;  %v2638_v59 = vld [vmem:[#allocation5 + $0x588] ss:$16 sps:$4 sm:$0xff]   ;;  %v2643_v60 = vld [vmem:[#allocation5 + $0x5a4] ss:$16 sps:$4 sm:$0xff]  }
  0xae   :  { %1409 = vmatprep.subr.bf16.mxu0 %v2551_v61  ;;  %1573 = vmatprep.subr.bf16.mxu1 %v2554_v62  ;;  %v2646_v61 = vld [vmem:[#allocation5 + $0x5ac] ss:$16 sps:$4 sm:$0xff]   ;;  %v2641_v62 = vld [vmem:[#allocation5 + $0x5a0] ss:$16 sps:$4 sm:$0xff]  }
  0xb1   :  { %1410 = vmatpush1.bf16.msra.mxu0 %v2549_v63  ;;  %1574 = vmatpush1.bf16.msra.mxu1 %v2552_v0  ;;  %v2644_v63 = vld [vmem:[#allocation5 + $0x5a8] ss:$16 sps:$4 sm:$0xff]   ;;  %v2649_v0 = vld [vmem:[#allocation5 + $0x5c4] ss:$16 sps:$4 sm:$0xff]  }
  0xb2   :  { %1411 = vmatprep.subr.bf16.mxu0 %v2557_v1  ;;  %1575 = vmatprep.subr.bf16.mxu1 %v2560_v2  ;;  %v2652_v1 = vld [vmem:[#allocation5 + $0x5cc] ss:$16 sps:$4 sm:$0xff]   ;;  %v2647_v2 = vld [vmem:[#allocation5 + $0x5c0] ss:$16 sps:$4 sm:$0xff]  }
  0xb5   :  { %1412 = vmatpush1.bf16.msra.mxu0 %v2555_v3  ;;  %1576 = vmatpush1.bf16.msra.mxu1 %v2558_v4  ;;  %v2650_v3 = vld [vmem:[#allocation5 + $0x5c8] ss:$16 sps:$4 sm:$0xff]   ;;  %v2655_v4 = vld [vmem:[#allocation5 + $0x5e4] ss:$16 sps:$4 sm:$0xff]  }
  0xb6   :  { %1422 = vmatprep.subr.bf16.mxu0 %v2565_v5  ;;  %1586 = vmatprep.subr.bf16.mxu1 %v2568_v6  ;;  %v2658_v5 = vld [vmem:[#allocation5 + $0x5ec] ss:$16 sps:$4 sm:$0xff]   ;;  %v2653_v6 = vld [vmem:[#allocation5 + $0x5e0] ss:$16 sps:$4 sm:$0xff]  }
  0xb8   :  { %1414 = vmatmul.mubr.bf16.vlgmr.msra.gmra.mrb[0].mxu0 %v2040_v7  ;;  %1578 = vmatmul.mubr.bf16.vlgmr.msra.gmra.mrb[0].mxu1 %v2040_v7  ;;  %v2656_v7 = vld [vmem:[#allocation5 + $0x5e8] ss:$16 sps:$4 sm:$0xff]  }
  0xb9   :  { %1423 = vmatpush1.bf16.msra.mxu0 %v2563_v8  ;;  %1587 = vmatpush1.bf16.msra.mxu1 %v2566_v9  ;;  %v2663_v8 = vld [vmem:[#allocation5 + $0x604] ss:$16 sps:$4 sm:$0xff]   ;;  %v2666_v9 = vld [vmem:[#allocation5 + $0x60c] ss:$16 sps:$4 sm:$0xff]  }
  0xba   :  { %1424 = vmatprep.subr.bf16.mxu0 %v2571_v10  ;;  %1588 = vmatprep.subr.bf16.mxu1 %v2574_v12  ;;  %v2042_v10 = vcombine.low %v2897_v11, %v2897_v11  ;;  %v2661_v12 = vld [vmem:[#allocation5 + $0x600] ss:$16 sps:$4 sm:$0xff]  }
  0xbb   :  { %1454 = vmatprep.mubr.bf16.mxu0 %v2043_v13  ;;  %1618 = vmatprep.mubr.bf16.mxu1 %v2043_v13  ;;  %v2664_v13 = vld [vmem:[#allocation5 + $0x608] ss:$16 sps:$4 sm:$0xff]  }
  0xbd   :  { %1425 = vmatpush1.bf16.msra.mxu0 %v2569_v14  ;;  %1589 = vmatpush1.bf16.msra.mxu1 %v2572_v15  ;;  %v2669_v14 = vld [vmem:[#allocation5 + $0x624] ss:$16 sps:$4 sm:$0xff]   ;;  %v2672_v15 = vld [vmem:[#allocation5 + $0x62c] ss:$16 sps:$4 sm:$0xff]  }
  0xbe   :  { %1426 = vmatprep.subr.bf16.mxu0 %v2577_v16  ;;  %1590 = vmatprep.subr.bf16.mxu1 %v2580_v17  ;;  %v265_v16 = vld [vmem:[#allocation5 + $0x640] sm:$0x11]  ;;  %v266_v17 = vld [vmem:[#allocation5 + $0x648] sm:$0x11] }
  0xbf   :  { %v2248_v11 = vcombine.high %v266_v17, %v266_v17 }
  0xc1   :  { %1427 = vmatpush1.bf16.msra.mxu0 %v2575_v18  ;;  %1591 = vmatpush1.bf16.msra.mxu1 %v2578_v19  ;;  %v2667_v18 = vld [vmem:[#allocation5 + $0x620] ss:$16 sps:$4 sm:$0xff]   ;;  %v2670_v19 = vld [vmem:[#allocation5 + $0x628] ss:$16 sps:$4 sm:$0xff]  }
  0xc2   :  { %1428 = vmatprep.subr.bf16.mxu0 %v2583_v20  ;;  %1592 = vmatprep.subr.bf16.mxu1 %v2586_v21  ;;  %v2246_v20 = vcombine.high %v265_v16, %v265_v16  ;;  %v2245_v21 = vcombine.low %v265_v16, %v265_v16 }
  0xc5   :  { %1429 = vmatpush1.bf16.msra.mxu0 %v2581_v22  ;;  %1593 = vmatpush1.bf16.msra.mxu1 %v2584_v23  ;;  %v2247_v22 = vcombine.low %v266_v17, %v266_v17  ;;  %v2823_v23 = vmov 0  }
  0xc6   :  { %1430 = vmatprep.subr.bf16.mxu0 %v2589_v24  ;;  %1594 = vmatprep.subr.bf16.mxu1 %v2592_v25  ;;  %v1329_v24 = vsel %vm1327_vm0, %v2245_v21, 0 }
  0xc7   :  { %v1335_v25 = vsel %vm1327_vm0, %v2247_v22, 0 }
  0xc9   :  { %1431 = vmatpush1.bf16.msra.mxu0 %v2587_v26  ;;  %1595 = vmatpush1.bf16.msra.mxu1 %v2590_v27  ;;  %v2678_v26 = vld [vmem:[#allocation7 + $0x40] sm:$0xff]  }
  0xca   :  { %1432 = vmatprep.subr.bf16.mxu0 %v2595_v28  ;;  %1596 = vmatprep.subr.bf16.mxu1 %v2598_v29  ;;  %v2679_v27 = vld [vmem:[#allocation7 + $0xc0] sm:$0xff]   ;;  %v2677_v28 = vld [vmem:[#allocation2 + $0x18] ss:$0 sps:$4 sm:$0xff]  }
  0xcb   :  { %v2680_v29 = vld [vmem:[#allocation7] sm:$0xff]  }
  0xcd   :  { %1433 = vmatpush1.bf16.msra.mxu0 %v2593_v30  ;;  %1597 = vmatpush1.bf16.msra.mxu1 %v2596_v31  ;;  %v2681_v30 = vld [vmem:[#allocation7 + $0x80] sm:$0xff]   ;;  %v2682_v31 = vld [vmem:[#allocation7 + $0x48] sm:$0xff]  }
  0xce   :  { %1434 = vmatprep.subr.bf16.mxu0 %v2601_v32  ;;  %1598 = vmatprep.subr.bf16.mxu1 %v2604_v33  ;;  %v2683_v32 = vld [vmem:[#allocation7 + $0xc8] sm:$0xff]  }
  0xcf   :  { %v2684_v33 = vld [vmem:[#allocation7 + $0x8] sm:$0xff]  }
  0xd1   :  { %1435 = vmatpush1.bf16.msra.mxu0 %v2599_v34  ;;  %1599 = vmatpush1.bf16.msra.mxu1 %v2602_v35  ;;  %v2685_v34 = vld [vmem:[#allocation7 + $0x88] sm:$0xff]   ;;  %v2686_v35 = vld [vmem:[#allocation7 + $0x50] sm:$0xff]  }
  0xd2   :  { %1436 = vmatprep.subr.bf16.mxu0 %v2607_v36  ;;  %1600 = vmatprep.subr.bf16.mxu1 %v2610_v37  ;;  %v2687_v36 = vld [vmem:[#allocation7 + $0xd0] sm:$0xff]  }
  0xd3   :  { %v2688_v37 = vld [vmem:[#allocation7 + $0x10] sm:$0xff]  }
  0xd5   :  { %1437 = vmatpush1.bf16.msra.mxu0 %v2605_v38  ;;  %1601 = vmatpush1.bf16.msra.mxu1 %v2608_v39  ;;  %v2689_v38 = vld [vmem:[#allocation7 + $0x90] sm:$0xff]   ;;  %v2690_v39 = vld [vmem:[#allocation7 + $0x58] sm:$0xff]  }
  0xd6   :  { %1438 = vmatprep.subr.bf16.mxu0 %v2613_v40  ;;  %1602 = vmatprep.subr.bf16.mxu1 %v2616_v41  ;;  %v2691_v40 = vld [vmem:[#allocation7 + $0xd8] sm:$0xff]  }
  0xd7   :  { %v2692_v41 = vld [vmem:[#allocation7 + $0x18] sm:$0xff]  }
  0xd9   :  { %1439 = vmatpush1.bf16.msra.mxu0 %v2611_v42  ;;  %1603 = vmatpush1.bf16.msra.mxu1 %v2614_v43  ;;  %v2693_v42 = vld [vmem:[#allocation7 + $0x98] sm:$0xff]   ;;  %v2694_v43 = vld [vmem:[#allocation7 + $0x60] sm:$0xff]  }
  0xda   :  { %1440 = vmatprep.subr.bf16.mxu0 %v2619_v44  ;;  %1604 = vmatprep.subr.bf16.mxu1 %v2622_v45  ;;  %v2695_v44 = vld [vmem:[#allocation7 + $0xe0] sm:$0xff]  }
  0xdb   :  { %v2696_v45 = vld [vmem:[#allocation7 + $0x20] sm:$0xff]  }
  0xdd   :  { %1441 = vmatpush1.bf16.msra.mxu0 %v2617_v46  ;;  %1605 = vmatpush1.bf16.msra.mxu1 %v2620_v47  ;;  %v2697_v46 = vld [vmem:[#allocation7 + $0xa0] sm:$0xff]   ;;  %v2698_v47 = vld [vmem:[#allocation7 + $0x68] sm:$0xff]  }
  0xde   :  { %1442 = vmatprep.subr.bf16.mxu0 %v2625_v48  ;;  %1606 = vmatprep.subr.bf16.mxu1 %v2628_v49  ;;  %v2699_v48 = vld [vmem:[#allocation7 + $0xe8] sm:$0xff]  }
  0xdf   :  { %v2700_v49 = vld [vmem:[#allocation7 + $0x28] sm:$0xff]  }
  0xe1   :  { %1443 = vmatpush1.bf16.msra.mxu0 %v2623_v50  ;;  %1607 = vmatpush1.bf16.msra.mxu1 %v2626_v51  ;;  %v2701_v50 = vld [vmem:[#allocation7 + $0xa8] sm:$0xff]   ;;  %v2702_v51 = vld [vmem:[#allocation7 + $0x70] sm:$0xff]  }
  0xe2   :  { %1444 = vmatprep.subr.bf16.mxu0 %v2631_v52  ;;  %1608 = vmatprep.subr.bf16.mxu1 %v2634_v53  ;;  %v2703_v52 = vld [vmem:[#allocation7 + $0xf0] sm:$0xff]  }
  0xe3   :  { %v2704_v53 = vld [vmem:[#allocation7 + $0x30] sm:$0xff]  }
  0xe5   :  { %1445 = vmatpush1.bf16.msra.mxu0 %v2629_v54  ;;  %1609 = vmatpush1.bf16.msra.mxu1 %v2632_v55  ;;  %v2705_v54 = vld [vmem:[#allocation7 + $0xb0] sm:$0xff]   ;;  %v2706_v55 = vld [vmem:[#allocation7 + $0x78] sm:$0xff]  }
  0xe6   :  { %1446 = vmatprep.subr.bf16.mxu0 %v2637_v56  ;;  %1610 = vmatprep.subr.bf16.mxu1 %v2640_v57  ;;  %v2707_v56 = vld [vmem:[#allocation7 + $0xf8] sm:$0xff]  }
  0xe7   :  { %v2708_v57 = vld [vmem:[#allocation7 + $0x38] sm:$0xff]  }
  0xe9   :  { %1447 = vmatpush1.bf16.msra.mxu0 %v2635_v58  ;;  %1611 = vmatpush1.bf16.msra.mxu1 %v2638_v59  ;;  %v2709_v58 = vld [vmem:[#allocation7 + $0xb8] sm:$0xff]   ;;  %v269_v59 = vlaneseq }
  0xea   :  { %1448 = vmatprep.subr.bf16.mxu0 %v2643_v60  ;;  %1612 = vmatprep.subr.bf16.mxu1 %v2646_v61 }
  0xeb   :  { %v270_v60 = vshrl.u32 %v269_v59, 7 }
  0xed   :  { %1449 = vmatpush1.bf16.msra.mxu0 %v2641_v62  ;;  %1613 = vmatpush1.bf16.msra.mxu1 %v2644_v63  ;;  %v271_v61 = vsub.s32 0, %v270_v60  ;;  %v279_v62 = vsub.s32 2, %v270_v60  ;;  %v267_v63 = vld [vmem:[%s2923_s2] sm:$0xf] }
  0xee   :  { %1450 = vmatprep.subr.bf16.mxu0 %v2649_v0  ;;  %1614 = vmatprep.subr.bf16.mxu1 %v2652_v1  ;;  %v275_v0 = vsub.s32 1, %v270_v60  ;;  %v283_v1 = vsub.s32 3, %v270_v60 }
  0xf1   :  { %1451 = vmatpush1.bf16.msra.mxu0 %v2647_v2  ;;  %1615 = vmatpush1.bf16.msra.mxu1 %v2650_v3  ;;  %v272_v2 = vrot.slane %v267_v63, %v271_v61  ;;  %v280_v3 = vrot.slane %v267_v63, %v279_v62 }
  0xf2   :  { %1452 = vmatprep.subr.bf16.mxu0 %v2655_v4  ;;  %1616 = vmatprep.subr.bf16.mxu1 %v2658_v5  ;;  %v276_v4 = vrot.slane %v267_v63, %v275_v0  ;;  %v284_v5 = vrot.slane %v267_v63, %v283_v1 }
  0xf5   :  { %1453 = vmatpush1.bf16.msra.mxu0 %v2653_v6  ;;  %1617 = vmatpush1.bf16.msra.mxu1 %v2656_v7 }
  0xf6   :  { %1463 = vmatprep.subr.bf16.mxu0 %v2663_v8  ;;  %1627 = vmatprep.subr.bf16.mxu1 %v2666_v9 }
  0xf8   :  { %1455 = vmatmul.mubr.bf16.vlgmr.msra.gmra.mrb[0].mxu0 %v2042_v10  ;;  %1619 = vmatmul.mubr.bf16.vlgmr.msra.gmra.mrb[0].mxu1 %v2042_v10 }
  0xf9   :  { %1464 = vmatpush1.bf16.msra.mxu0 %v2661_v12  ;;  %1628 = vmatpush1.bf16.msra.mxu1 %v2664_v13 }
  0xfa   :  { %1465 = vmatprep.subr.bf16.mxu0 %v2669_v14  ;;  %1629 = vmatprep.subr.bf16.mxu1 %v2672_v15 }
  0xfb   :  { %1495 = vmatprep.mubr.bf16.mxu0 %v2823_v23  ;;  %1659 = vmatprep.mubr.bf16.mxu1 %v2823_v23 }
  0xfd   :  { %1466 = vmatpush1.bf16.msra.mxu0 %v2667_v18  ;;  %1630 = vmatpush1.bf16.msra.mxu1 %v2670_v19 }
  0xfe   :  { %2249 = vmatprep.subr.msk.bf16.mxu0 %vm1327_vm0, %v2246_v20  ;;  %2251 = vmatprep.subr.msk.bf16.mxu1 %vm1327_vm0, %v2248_v11 }
 0x101   :  { %1468 = vmatpush1.bf16.msra.mxu0 %v1329_v24  ;;  %1632 = vmatpush1.bf16.msra.mxu1 %v1335_v25 }
 0x102   :  { %2286 = vmatprep.subr.bf16.mxu0 %v2678_v26  ;;  %2308 = vmatprep.subr.bf16.mxu1 %v2679_v27 }
 0x104   :  { %2250 = vmatmul.mubr.msk.bf16.vlgmr.msra.gmra.mrb[0].mxu0 %vm1323_vm1, %v2677_v28  ;;  %2252 = vmatmul.mubr.msk.bf16.vlgmr.msra.gmra.mrb[0].mxu1 %vm1323_vm1, %v2677_v28  ;;  %v2253_v28 = vld [vmem:[%s2925_s4] ss:$0 sm:$0xff] }
 0x105   :  { %2287 = vmatpush3.bf16.msra.mxu0 %v2680_v29  ;;  %2309 = vmatpush3.bf16.msra.mxu1 %v2681_v30 }
 0x106   :  { %2288 = vmatprep.subr.bf16.mxu0 %v2682_v31  ;;  %2310 = vmatprep.subr.bf16.mxu1 %v2683_v32 }
 0x109   :  { %2289 = vmatpush3.bf16.msra.mxu0 %v2684_v33  ;;  %2311 = vmatpush3.bf16.msra.mxu1 %v2685_v34 }
 0x10a   :  { %2290 = vmatprep.subr.bf16.mxu0 %v2686_v35  ;;  %2312 = vmatprep.subr.bf16.mxu1 %v2687_v36 }
 0x10d   :  { %2291 = vmatpush3.bf16.msra.mxu0 %v2688_v37  ;;  %2313 = vmatpush3.bf16.msra.mxu1 %v2689_v38 }
 0x10e   :  { %2292 = vmatprep.subr.bf16.mxu0 %v2690_v39  ;;  %2314 = vmatprep.subr.bf16.mxu1 %v2691_v40 }
 0x111   :  { %2293 = vmatpush3.bf16.msra.mxu0 %v2692_v41  ;;  %2315 = vmatpush3.bf16.msra.mxu1 %v2693_v42 }
 0x112   :  { %2294 = vmatprep.subr.bf16.mxu0 %v2694_v43  ;;  %2316 = vmatprep.subr.bf16.mxu1 %v2695_v44 }
 0x115   :  { %2295 = vmatpush3.bf16.msra.mxu0 %v2696_v45  ;;  %2317 = vmatpush3.bf16.msra.mxu1 %v2697_v46 }
 0x116   :  { %2296 = vmatprep.subr.bf16.mxu0 %v2698_v47  ;;  %2318 = vmatprep.subr.bf16.mxu1 %v2699_v48 }
 0x119   :  { %2297 = vmatpush3.bf16.msra.mxu0 %v2700_v49  ;;  %2319 = vmatpush3.bf16.msra.mxu1 %v2701_v50 }
 0x11a   :  { %2298 = vmatprep.subr.bf16.mxu0 %v2702_v51  ;;  %2320 = vmatprep.subr.bf16.mxu1 %v2703_v52 }
 0x11d   :  { %2299 = vmatpush3.bf16.msra.mxu0 %v2704_v53  ;;  %2321 = vmatpush3.bf16.msra.mxu1 %v2705_v54 }
 0x11e   :  { %2300 = vmatprep.subr.bf16.mxu0 %v2706_v55  ;;  %2322 = vmatprep.subr.bf16.mxu1 %v2707_v56 }
 0x121   :  { %2301 = vmatpush3.bf16.msra.mxu0 %v2708_v57  ;;  %2323 = vmatpush3.bf16.msra.mxu1 %v2709_v58 }
 0x1d7   :  { %v1497_v6 = vpop.f32.mrb[0].mxu0  ;;  %v1661_v7 = vpop.f32.mrb[0].mxu1 }
 0x1d8   :  { %v2330_v8 = vadd.f32 %v1497_v6, %v272_v2  ;;  %v2332_v9 = vadd.f32 %v1661_v7, %v280_v3  ;;  %v1499_v10 = vpop.f32.mrb[1].mxu0  ;;  %v1663_v12 = vpop.f32.mrb[1].mxu1 }
 0x1d9   :  { %v2331_v13 = vadd.f32 %v1499_v10, %v276_v4  ;;  %v2333_v14 = vadd.f32 %v1663_v12, %v284_v5  ;;  %v1501_v15 = vpop.f32.mrb[2].mxu0  ;;  %v1665_v16 = vpop.f32.mrb[2].mxu1 }
 0x1da   :  { %2710 = vtanh.f32 %v2330_v8  ;;  %v1502_v17 = vpop.f32.mrb[3].mxu0  ;;  %v1666_v18 = vpop.f32.mrb[3].mxu1 }
 0x1db   :  { %2712 = vtanh.f32 %v2332_v9 }
 0x1dc   :  { %2714 = vtanh.f32 %v2331_v13 }
 0x1dd   :  { %2716 = vtanh.f32 %v2333_v14 }
 0x1e4   :  { %v2711_v19 = vpop.eup %2710 }
 0x1e5   :  { %v2713_v20 = vpop.eup %2712  ;;  %v1672_v23 = vpack.c.bf16 %v2711_v19, %v2711_v19 }
 0x1e6   :  { %v2715_v11 = vpop.eup %2714  ;;  %v1674_v25 = vpack.c.bf16 %v2713_v20, %v2713_v20 }
 0x1e7   :  { %v2717_v21 = vpop.eup %2716  ;;  %v1673_v22 = vpack.c.bf16 %v2715_v11, %v2715_v11 }
 0x1e8   :  { %v1675_v24 = vpack.c.bf16 %v2717_v21, %v2717_v21 }
 0x1e9   :  { %1971 = vmatprep.mubr.bf16.mxu0 %v1673_v22 }
 0x1ea   :  { %2011 = vmatprep.mubr.bf16.mxu1 %v1675_v24  ;;  %1972 = vmatmul.mubr.bf16.vlgmr.msra.gmra.mrb[4].mxu0 %v1672_v23 }
 0x1eb   :  { %2012 = vmatmul.mubr.bf16.vlgmr.msra.gmra.mrb[4].mxu1 %v1674_v25 }
 0x2bd   :  { %v2302_v26 = vpop.f32.mrb[4].mxu0 }
 0x2be   :  { %v2324_v27 = vpop.f32.mrb[4].mxu1  ;;  %v2303_v29 = vpop.f32.mrb[5].mxu0 }
 0x2bf   :  { %v2304_v30 = vadd.f32 %v2303_v29, %v2302_v26  ;;  %v2325_v31 = vpop.f32.mrb[5].mxu1  ;;  %v2305_v32 = vpop.f32.mrb[6].mxu0 }
 0x2c0   :  { %v2326_v33 = vadd.f32 %v2325_v31, %v2324_v27  ;;  %v2327_v34 = vpop.f32.mrb[6].mxu1  ;;  %v2306_v35 = vpop.f32.mrb[7].mxu0 }
 0x2c1   :  { %v1974_v36 = vadd.f32 %v2304_v30, %v2253_v28  ;;  %v2328_v37 = vpop.f32.mrb[7].mxu1 }
 0x2c3   :  { %v2014_v38 = vadd.f32 %v2326_v33, %v1974_v36 }
 0x2c5   :  { %2718 = vtanh.f32 %v2014_v38 }
 0x2cf   :  { %v2719_v39 = vpop.eup %2718 }
 0x2d0   :  { %2720 = vtanh.f32 %v2719_v39 }
 0x2da   :  { %v2721_v40 = vpop.eup %2720 }
 0x2db   :  { %2021 = vst [vmem:[#allocation8] sm:$0xff] %v2721_v40 }
 0x2dc   :  { %2799 = shalt.err (!%p2796_p0)
}
 0x2dd   :  { %s2800_s12 = scalar_lea.hbm %s2926_s5, 128 }
 0x2de   :  { %p2801_p1 = scmp.ne.s32.totalorder %s2926_s5, %s2800_s12  ;;  %p2804_p2 = scmp.lt.u32.totalorder %s2800_s12, %s2926_s5 }
 0x2e0   :  { %p2806_p3 = pnand %p2804_p2, %p2801_p1 }
 0x2e2   :  { %2809 = shalt.err (!%p2806_p3)
}
 0x2e3   :  { %2031 = dma.vmem_to_hbm [thread:$0]  %s2029_s9, 128, %s2926_s5, [#allocation4]  }
 0x2e4   :  { %2814 = dma.done.wait [#allocation4], 128  }
 0x2e5   :  { %2815 = vsyncadd [#allocation4], 4294967168 }
 0x2e6   :  { %2035 = vsyncpa [#allocation3], 1 }
 0x2e7   :  { %2036 = vsyncpa [#allocation6], 1 }
 0x2e8   :  { %2037 = vsyncpa [#allocation4], 1 }

</bundles_post_ra>
